<compile_context>
chip_gen: v7x
topology: tpu7x:2x2x1
jax: 0.10.0
libtpu: 0.0.40
codegen_flags: <defaults>
</compile_context>

<pallas_src>
import functools

import numpy as np
import jax
import jax.numpy as jnp
from jax import lax
from jax.experimental import pallas as pl
from jax.experimental.pallas import tpu as pltpu

N_NODES = 14
N_EDGES = 44
IN_FEATS = 16
OUT_FEATS = 32

E_PAD = 48              # 44 edge rows zero-padded to a multiple of 8 sublanes
GROUP = 8               # samples fused along lanes: GROUP * IN_FEATS = 128 lanes
K_GROUPS_DEFAULT = 64   # groups per grid step (per-step streamed bytes ~4.5 MiB)


# ----------------------------------------------------------------------------
# Graph construction + host-side operator fold (data-independent, done once).
# ----------------------------------------------------------------------------
def build_edge_list():
    """Deterministic 14-node / 44-edge graph; every node has in-degree >= 3."""
    edges = []
    for s in range(1, 4):                      # skip-1, skip-2, skip-3 rings = 42 edges
        for i in range(N_NODES):
            edges.append((i, (i + s) % N_NODES))
    edges.append((0, 7))
    edges.append((1, 8))
    assert len(edges) == N_EDGES
    return edges


def build_operators(edge_list):
    in_deg = np.zeros((N_NODES,), np.float32)
    for (_, d) in edge_list:
        in_deg[d] += 1.0

    a_mean = np.zeros((N_NODES, N_EDGES), np.float32)   # node_h0 = A_mean @ edge_h0
    for e, (_, d) in enumerate(edge_list):
        a_mean[d, e] = 1.0 / in_deg[d]

    a_adj = np.zeros((N_NODES, N_NODES), np.float32)    # node_h' = A_adj @ node_h
    for (s, d) in edge_list:
        a_adj[d, s] += 1.0

    b_edge = np.zeros((N_EDGES, N_NODES), np.float32)   # edge_h = B_edge @ node_h2
    for e, (s, d) in enumerate(edge_list):
        b_edge[e, s] += 0.5
        b_edge[e, d] += 0.5

    # Fold the whole (data-independent) message-passing chain into one matrix.
    m_fold = b_edge @ a_adj @ a_adj @ a_mean             # (E, E)
    return a_mean, a_adj, b_edge, m_fold


def init_gcn_constants(m_fold_np, w_t, bias):
    """Build the three kernel constants ONCE (host-side), not on every forward."""
    m_pad = np.zeros((E_PAD, E_PAD), np.float32)
    m_pad[:N_EDGES, :N_EDGES] = np.asarray(m_fold_np, np.float32)
    # Per-sample nn.Linear applied in one matmul via block-diagonal weights.
    w_big = np.kron(np.eye(GROUP, dtype=np.float32),
                    np.asarray(w_t, np.float32))          # (128, 256)
    b_big = np.tile(np.asarray(bias, np.float32), (1, GROUP))   # (1, 256)
    return jnp.asarray(m_pad), jnp.asarray(w_big), jnp.asarray(b_big)


# ----------------------------------------------------------------------------
# Packed slab layout (canonical activation layout between GCN layers).
# ----------------------------------------------------------------------------
def pack_edge_features(x_batch, *, k_groups):
    """(B, 44, 16) -> (G*48, 128) slab.

    Sample b of a group occupies lanes [b*16, (b+1)*16).  Batch is zero-padded
    to a multiple of GROUP*k_groups; edge rows are zero-padded 44 -> 48.
    Do this once per network, not once per layer.
    """
    B = x_batch.shape[0]
    n_groups = -(-B // GROUP)
    n_groups = -(-n_groups // k_groups) * k_groups        # multiple of k_groups
    b_pad = n_groups * GROUP
    x_pad = jnp.pad(x_batch, ((0, b_pad - B), (0, E_PAD - N_EDGES), (0, 0)))
    x_slab = (x_pad.reshape(n_groups, GROUP, E_PAD, IN_FEATS)
                   .transpose(0, 2, 1, 3)
                   .reshape(n_groups * E_PAD, GROUP * IN_FEATS))
    return x_slab


def unpack_edge_outputs(out_slab, batch_size):
    """(G*48, 256) slab -> (B, 44, 32); drops batch / edge padding."""
    n_groups = out_slab.shape[0] // E_PAD
    out = (out_slab.reshape(n_groups, E_PAD, GROUP, OUT_FEATS)
                   .transpose(0, 2, 1, 3)
                   .reshape(n_groups * GROUP, E_PAD, OUT_FEATS))
    # NOTE: padded edge rows 44..47 contain only the bias (added to all 48 rows);
    # they are discarded here, never reduce over the padded slab upstream.
    return out[:batch_size, :N_EDGES, :]


# ----------------------------------------------------------------------------
# Pallas kernel.
# ----------------------------------------------------------------------------
def _gcn_kernel(m_ref, w_ref, b_ref, x_ref, out_ref, *, k_groups):
    """One grid step = k_groups independent (48, 128) groups of 8 samples.

    Per group: h = M @ x (all graph aggregation folded into one (48,48) matmul),
    then out = h @ W_big + bias (per-sample linear via block-diagonal weights).
    """
    def body(i, carry):
        row = pl.multiple_of(i * E_PAD, E_PAD)
        x_sub = x_ref[pl.ds(row, E_PAD), :]                                   # (48, 128)
        h = jnp.dot(m_ref[...], x_sub, preferred_element_type=jnp.float32)    # (48, 128)
        out_ref[pl.ds(row, E_PAD), :] = (
            jnp.dot(h, w_ref[...], preferred_element_type=jnp.float32)
            + b_ref[...]
        )                                                                     # (48, 256)
        return carry

    # Unrolled so the LLO scheduler can overlap the k_groups sub-blocks.
    lax.fori_loop(0, k_groups, body, 0, unroll=True)


def gcn_layer_forward_packed(x_slab, m_pad, w_big, b_big, *, k_groups=K_GROUPS_DEFAULT):
    """Forward on the packed slab: (G*48, 128) -> (G*48, 256).

    Constants (m_pad, w_big, b_big) must come from init_gcn_constants (built once).
    """
    n_rows, lanes = x_slab.shape
    assert lanes == GROUP * IN_FEATS
    n_groups = n_rows // E_PAD
    assert n_rows == n_groups * E_PAD
    k = min(k_groups, n_groups)
    assert n_groups % k == 0, "pack_edge_features must use the same k_groups"
    n_steps = n_groups // k

    # Advisory cost estimate so XLA schedules surrounding ops around the call.
    flops_per_group = 2 * E_PAD * (GROUP * IN_FEATS) * (E_PAD + GROUP * OUT_FEATS)
    bytes_per_group = E_PAD * GROUP * (IN_FEATS + OUT_FEATS) * 4
    cost = pl.CostEstimate(
        flops=flops_per_group * n_groups,
        transcendentals=0,
        bytes_accessed=bytes_per_group * n_groups
        + 4 * (m_pad.size + w_big.size + b_big.size),
    )

    return pl.pallas_call(
        functools.partial(_gcn_kernel, k_groups=k),
        out_shape=jax.ShapeDtypeStruct((n_rows, GROUP * OUT_FEATS), jnp.float32),
        grid_spec=pltpu.PrefetchScalarGridSpec(
            num_scalar_prefetch=0,
            grid=(n_steps,),
            in_specs=[
                # Constant operands: constant index_map -> fetched once, resident in VMEM.
                pl.BlockSpec((E_PAD, E_PAD), lambda g: (0, 0)),                      # M
                pl.BlockSpec((GROUP * IN_FEATS, GROUP * OUT_FEATS),
                             lambda g: (0, 0)),                                      # W_big
                pl.BlockSpec((1, GROUP * OUT_FEATS), lambda g: (0, 0)),              # bias
                # Streaming input: k groups of 48 rows per grid step.
                pl.BlockSpec((k * E_PAD, GROUP * IN_FEATS), lambda g: (g, 0)),       # x
            ],
            out_specs=pl.BlockSpec((k * E_PAD, GROUP * OUT_FEATS), lambda g: (g, 0)),
        ),
        compiler_params=pltpu.CompilerParams(dimension_semantics=("parallel",)),
        cost_estimate=cost,
    )(m_pad, w_big, b_big, x_slab)


# ----------------------------------------------------------------------------
# Pure-JAX reference (unfolded per-sample chain) for verification.
# ----------------------------------------------------------------------------
def reference_forward(x_batch, a_mean, a_adj, b_edge, w_t, bias):
    def one(x):
        h0 = a_mean @ x
        h1 = a_adj @ h0
        h2 = a_adj @ h1
        eh = b_edge @ h2
        return eh @ w_t + bias
    return jax.vmap(one)(x_batch)


if __name__ == "__main__":
    edge_list = build_edge_list()
    a_mean_np, a_adj_np, b_edge_np, m_fold_np = build_operators(edge_list)

    key = jax.random.PRNGKey(0)
    k_x, k_w, k_b = jax.random.split(key, 3)

    # Small, ragged batch: 61 samples -> padded internally to 64 = 2 grid steps
    # of 4 groups of 8 samples (exercises the unrolled inner loop, the grid,
    # and the remainder-padding path).
    B = 61
    K_GROUPS_DEMO = 4
    x = jax.random.normal(k_x, (B, N_EDGES, IN_FEATS), dtype=jnp.float32)

    # nn.Linear(in_feats, out_feats); weigth_init gives weight ~ N(0, 0.01), bias = 0.
    # Use a small nonzero bias here to exercise the bias path of the kernel.
    w = 0.01 * jax.random.normal(k_w, (OUT_FEATS, IN_FEATS), dtype=jnp.float32)
    w_t = jnp.transpose(w)                                  # (in_feats, out_feats)
    bias = 0.01 * jax.random.normal(k_b, (1, OUT_FEATS), dtype=jnp.float32)

    # "Layer init": constants built once, reused by every forward call.
    m_pad, w_big, b_big = init_gcn_constants(m_fold_np, w_t, bias)

    # Pack once (in a multi-layer GNN the packed slab stays the activation layout).
    x_slab = pack_edge_features(x, k_groups=K_GROUPS_DEMO)

    out_slab = gcn_layer_forward_packed(x_slab, m_pad, w_big, b_big,
                                        k_groups=K_GROUPS_DEMO)
    out_slab = jax.block_until_ready(out_slab)
    out = unpack_edge_outputs(out_slab, B)

    ref = reference_forward(x, jnp.asarray(a_mean_np), jnp.asarray(a_adj_np),
                            jnp.asarray(b_edge_np), w_t, bias)
    np.testing.assert_allclose(np.asarray(out), np.asarray(ref), rtol=1e-4, atol=1e-5)

    print("KERNEL_OK")
</pallas_src>

<mosaic_0001>
module attributes {stable_mosaic.version = 11 : i64} {
  func.func @_gcn_kernel(%arg0: i32, %arg1: memref<48x48xf32, #tpu.memory_space<vmem>>, %arg2: memref<128x256xf32, #tpu.memory_space<vmem>>, %arg3: memref<1x256xf32, #tpu.memory_space<vmem>>, %arg4: memref<192x128xf32, #tpu.memory_space<vmem>>, %arg5: memref<192x256xf32, #tpu.memory_space<vmem>>) attributes {dimension_semantics = [#tpu.dimension_semantics<parallel>], iteration_bounds = array<i64: 2>, scalar_prefetch = 0 : i64, scratch_operands = 0 : i64, tpu.core_type = #tpu.core_type<tc>, window_params = [{pipeline_mode = #tpu.pipeline_mode<synchronous>, transform_indices = @transform_0, window_bounds = array<i64: 48, 48>}, {pipeline_mode = #tpu.pipeline_mode<synchronous>, transform_indices = @transform_1, window_bounds = array<i64: 128, 256>}, {pipeline_mode = #tpu.pipeline_mode<synchronous>, transform_indices = @transform_2, window_bounds = array<i64: 1, 256>}, {transform_indices = @transform_3, window_bounds = array<i64: 192, 128>}, {transform_indices = @transform_4, window_bounds = array<i64: 192, 256>}]} {
    %c0_i32 = arith.constant 0 : i32
    %c48_i32 = arith.constant 48 : i32
    %0 = arith.muli %c0_i32, %c48_i32 : i32
    %1 = tpu.assume_multiple %0, 48 : i32
    %2 = arith.index_cast %1 : i32 to index
    %c0 = arith.constant 0 : index
    %3 = vector.load %arg4[%2, %c0] : memref<192x128xf32, #tpu.memory_space<vmem>>, vector<48x128xf32>
    %c0_0 = arith.constant 0 : index
    %c0_1 = arith.constant 0 : index
    %4 = vector.load %arg1[%c0_0, %c0_1] : memref<48x48xf32, #tpu.memory_space<vmem>>, vector<48x48xf32>
    %cst = arith.constant dense<0.000000e+00> : vector<48x128xf32>
    %5 = tpu.matmul %4, %3, %cst {dimension_numbers = #tpu.dot_dimension_numbers<[1], [0], [0], [1], [0, 0, 1, 1], [], []>} : vector<48x48xf32>, vector<48x128xf32>, vector<48x128xf32> -> vector<48x128xf32>
    %c0_2 = arith.constant 0 : index
    %c0_3 = arith.constant 0 : index
    %6 = vector.load %arg2[%c0_2, %c0_3] : memref<128x256xf32, #tpu.memory_space<vmem>>, vector<128x256xf32>
    %cst_4 = arith.constant dense<0.000000e+00> : vector<48x256xf32>
    %7 = tpu.matmul %5, %6, %cst_4 {dimension_numbers = #tpu.dot_dimension_numbers<[1], [0], [0], [1], [0, 0, 1, 1], [], []>} : vector<48x128xf32>, vector<128x256xf32>, vector<48x256xf32> -> vector<48x256xf32>
    %c0_5 = arith.constant 0 : index
    %c0_6 = arith.constant 0 : index
    %8 = vector.load %arg3[%c0_5, %c0_6] : memref<1x256xf32, #tpu.memory_space<vmem>>, vector<1x256xf32>
    %9 = vector.broadcast %8 : vector<1x256xf32> to vector<48x256xf32>
    %10 = arith.addf %7, %9 : vector<48x256xf32>
    %11 = arith.index_cast %1 : i32 to index
    %c0_7 = arith.constant 0 : index
    %12 = vector.load %arg5[%11, %c0_7] : memref<192x256xf32, #tpu.memory_space<vmem>>, vector<48x256xf32>
    tpu.vector_store %arg5[%11, %c0_7], %10 {strides = array<i32>} : memref<192x256xf32, #tpu.memory_space<vmem>>, vector<48x256xf32>,
    %c1_i32 = arith.constant 1 : i32
    %c48_i32_8 = arith.constant 48 : i32
    %13 = arith.muli %c1_i32, %c48_i32_8 : i32
    %14 = tpu.assume_multiple %13, 48 : i32
    %15 = arith.index_cast %14 : i32 to index
    %c0_9 = arith.constant 0 : index
    %16 = vector.load %arg4[%15, %c0_9] : memref<192x128xf32, #tpu.memory_space<vmem>>, vector<48x128xf32>
    %c0_10 = arith.constant 0 : index
    %c0_11 = arith.constant 0 : index
    %17 = vector.load %arg1[%c0_10, %c0_11] : memref<48x48xf32, #tpu.memory_space<vmem>>, vector<48x48xf32>
    %cst_12 = arith.constant dense<0.000000e+00> : vector<48x128xf32>
    %18 = tpu.matmul %17, %16, %cst_12 {dimension_numbers = #tpu.dot_dimension_numbers<[1], [0], [0], [1], [0, 0, 1, 1], [], []>} : vector<48x48xf32>, vector<48x128xf32>, vector<48x128xf32> -> vector<48x128xf32>
    %c0_13 = arith.constant 0 : index
    %c0_14 = arith.constant 0 : index
    %19 = vector.load %arg2[%c0_13, %c0_14] : memref<128x256xf32, #tpu.memory_space<vmem>>, vector<128x256xf32>
    %cst_15 = arith.constant dense<0.000000e+00> : vector<48x256xf32>
    %20 = tpu.matmul %18, %19, %cst_15 {dimension_numbers = #tpu.dot_dimension_numbers<[1], [0], [0], [1], [0, 0, 1, 1], [], []>} : vector<48x128xf32>, vector<128x256xf32>, vector<48x256xf32> -> vector<48x256xf32>
    %c0_16 = arith.constant 0 : index
    %c0_17 = arith.constant 0 : index
    %21 = vector.load %arg3[%c0_16, %c0_17] : memref<1x256xf32, #tpu.memory_space<vmem>>, vector<1x256xf32>
    %22 = vector.broadcast %21 : vector<1x256xf32> to vector<48x256xf32>
    %23 = arith.addf %20, %22 : vector<48x256xf32>
    %24 = arith.index_cast %14 : i32 to index
    %c0_18 = arith.constant 0 : index
    %25 = vector.load %arg5[%24, %c0_18] : memref<192x256xf32, #tpu.memory_space<vmem>>, vector<48x256xf32>
    tpu.vector_store %arg5[%24, %c0_18], %23 {strides = array<i32>} : memref<192x256xf32, #tpu.memory_space<vmem>>, vector<48x256xf32>,
    %c2_i32 = arith.constant 2 : i32
    %c48_i32_19 = arith.constant 48 : i32
    %26 = arith.muli %c2_i32, %c48_i32_19 : i32
    %27 = tpu.assume_multiple %26, 48 : i32
    %28 = arith.index_cast %27 : i32 to index
    %c0_20 = arith.constant 0 : index
    %29 = vector.load %arg4[%28, %c0_20] : memref<192x128xf32, #tpu.memory_space<vmem>>, vector<48x128xf32>
    %c0_21 = arith.constant 0 : index
    %c0_22 = arith.constant 0 : index
    %30 = vector.load %arg1[%c0_21, %c0_22] : memref<48x48xf32, #tpu.memory_space<vmem>>, vector<48x48xf32>
    %cst_23 = arith.constant dense<0.000000e+00> : vector<48x128xf32>
    %31 = tpu.matmul %30, %29, %cst_23 {dimension_numbers = #tpu.dot_dimension_numbers<[1], [0], [0], [1], [0, 0, 1, 1], [], []>} : vector<48x48xf32>, vector<48x128xf32>, vector<48x128xf32> -> vector<48x128xf32>
    %c0_24 = arith.constant 0 : index
    %c0_25 = arith.constant 0 : index
    %32 = vector.load %arg2[%c0_24, %c0_25] : memref<128x256xf32, #tpu.memory_space<vmem>>, vector<128x256xf32>
    %cst_26 = arith.constant dense<0.000000e+00> : vector<48x256xf32>
    %33 = tpu.matmul %31, %32, %cst_26 {dimension_numbers = #tpu.dot_dimension_numbers<[1], [0], [0], [1], [0, 0, 1, 1], [], []>} : vector<48x128xf32>, vector<128x256xf32>, vector<48x256xf32> -> vector<48x256xf32>
    %c0_27 = arith.constant 0 : index
    %c0_28 = arith.constant 0 : index
    %34 = vector.load %arg3[%c0_27, %c0_28] : memref<1x256xf32, #tpu.memory_space<vmem>>, vector<1x256xf32>
    %35 = vector.broadcast %34 : vector<1x256xf32> to vector<48x256xf32>
    %36 = arith.addf %33, %35 : vector<48x256xf32>
    %37 = arith.index_cast %27 : i32 to index
    %c0_29 = arith.constant 0 : index
    %38 = vector.load %arg5[%37, %c0_29] : memref<192x256xf32, #tpu.memory_space<vmem>>, vector<48x256xf32>
    tpu.vector_store %arg5[%37, %c0_29], %36 {strides = array<i32>} : memref<192x256xf32, #tpu.memory_space<vmem>>, vector<48x256xf32>,
    %c3_i32 = arith.constant 3 : i32
    %c48_i32_30 = arith.constant 48 : i32
    %39 = arith.muli %c3_i32, %c48_i32_30 : i32
    %40 = tpu.assume_multiple %39, 48 : i32
    %41 = arith.index_cast %40 : i32 to index
    %c0_31 = arith.constant 0 : index
    %42 = vector.load %arg4[%41, %c0_31] : memref<192x128xf32, #tpu.memory_space<vmem>>, vector<48x128xf32>
    %c0_32 = arith.constant 0 : index
    %c0_33 = arith.constant 0 : index
    %43 = vector.load %arg1[%c0_32, %c0_33] : memref<48x48xf32, #tpu.memory_space<vmem>>, vector<48x48xf32>
    %cst_34 = arith.constant dense<0.000000e+00> : vector<48x128xf32>
    %44 = tpu.matmul %43, %42, %cst_34 {dimension_numbers = #tpu.dot_dimension_numbers<[1], [0], [0], [1], [0, 0, 1, 1], [], []>} : vector<48x48xf32>, vector<48x128xf32>, vector<48x128xf32> -> vector<48x128xf32>
    %c0_35 = arith.constant 0 : index
    %c0_36 = arith.constant 0 : index
    %45 = vector.load %arg2[%c0_35, %c0_36] : memref<128x256xf32, #tpu.memory_space<vmem>>, vector<128x256xf32>
    %cst_37 = arith.constant dense<0.000000e+00> : vector<48x256xf32>
    %46 = tpu.matmul %44, %45, %cst_37 {dimension_numbers = #tpu.dot_dimension_numbers<[1], [0], [0], [1], [0, 0, 1, 1], [], []>} : vector<48x128xf32>, vector<128x256xf32>, vector<48x256xf32> -> vector<48x256xf32>
    %c0_38 = arith.constant 0 : index
    %c0_39 = arith.constant 0 : index
    %47 = vector.load %arg3[%c0_38, %c0_39] : memref<1x256xf32, #tpu.memory_space<vmem>>, vector<1x256xf32>
    %48 = vector.broadcast %47 : vector<1x256xf32> to vector<48x256xf32>
    %49 = arith.addf %46, %48 : vector<48x256xf32>
    %50 = arith.index_cast %40 : i32 to index
    %c0_40 = arith.constant 0 : index
    %51 = vector.load %arg5[%50, %c0_40] : memref<192x256xf32, #tpu.memory_space<vmem>>, vector<48x256xf32>
    tpu.vector_store %arg5[%50, %c0_40], %49 {strides = array<i32>} : memref<192x256xf32, #tpu.memory_space<vmem>>, vector<48x256xf32>,
    %c4_i32 = arith.constant 4 : i32
    return
  }
  func.func @transform_0(%arg0: i32) -> (i32, i32) {
    %c0_i32 = arith.constant 0 : i32
    %c0_i32_0 = arith.constant 0 : i32
    %c0_i32_1 = arith.constant 0 : i32
    return %c0_i32, %c0_i32_0 : i32, i32
  }
  func.func @transform_1(%arg0: i32) -> (i32, i32) {
    %c0_i32 = arith.constant 0 : i32
    %c0_i32_0 = arith.constant 0 : i32
    %c0_i32_1 = arith.constant 0 : i32
    return %c0_i32, %c0_i32_0 : i32, i32
  }
  func.func @transform_2(%arg0: i32) -> (i32, i32) {
    %c0_i32 = arith.constant 0 : i32
    %c0_i32_0 = arith.constant 0 : i32
    %c0_i32_1 = arith.constant 0 : i32
    return %c0_i32, %c0_i32_0 : i32, i32
  }
  func.func @transform_3(%arg0: i32) -> (i32, i32) {
    %c0_i32 = arith.constant 0 : i32
    %c0_i32_0 = arith.constant 0 : i32
    return %arg0, %c0_i32 : i32, i32
  }
  func.func @transform_4(%arg0: i32) -> (i32, i32) {
    %c0_i32 = arith.constant 0 : i32
    %c0_i32_0 = arith.constant 0 : i32
    return %arg0, %c0_i32 : i32, i32
  }
}

</mosaic_0001>

<bundles_post_ra>
// kernel: tpu_custom_call.1
= control target key start
LH: loop header
LB: loop body
LE: loop exit
PB: predicated region body
PF: predicated region fallthrough
CT: control target
= control target key end

     0   :  { %s2712_s0 = inlined_call_operand.hbm [shape: f32[48,48], index: 0, kind: input, shape index: {}]   ;;  %s2713_s1 = inlined_call_operand.hbm [shape: f32[128,256], index: 1, kind: input, shape index: {}]   ;;  %s2714_s2 = inlined_call_operand.vmem [shape: f32[1,256], index: 2, kind: input, shape index: {}]   ;;  %s2715_s3 = inlined_call_operand.hbm [shape: f32[384,128], index: 3, kind: input, shape index: {}]   ;;  %s2716_s4 = inlined_call_operand.hbm [shape: f32[384,256], index: 4, kind: output, shape index: {}]  }
   0x1   :  { %2724 = sst [smem:[#allocation13_spill]] %s2712_s0 }
   0x2   :  { %9 = vsyncpa [#allocation3], 0 }
   0x3   :  { %10 = vsyncpa [#allocation6], 0 }
   0x4   :  { %11 = vsyncpa [#allocation4], 0 }
   0x5   :  { %13 = vsyncpa [#allocation4 + $0x1], 0  ;;  %s2177_s15 = smov 0   ;;  %s2179_s16 = smov 0  }
   0x6   :  { %s2181_s17 = smov 0   ;;  %s2183_s18 = smov 0  }
   0x7 LB: > { %s2198_s19 = sadd.s32 4294967295, %s2139_s18   ;;  %s1499_s20 = sadd.s32 4294967294, %s2139_s18   ;;  %s2139_s18 = sphi %s2183_s18, %s2750_s18   ;;  %s2135_s17 = sphi %s2181_s17, %s2749_s17   ;;  %s2131_s16 = sphi %s2179_s16, %s2748_s16   ;;  %s2127_s15 = sphi %s2177_s15, %s2747_s15  }
   0x8   : > { %s2202_s21 = sadd.s32 1, %s2139_s18   ;;  %s89_s22 = sadd.s32 1, %s2135_s17 }
   0x9   : > { %s86_s23 = ssub.s32 %s2139_s18, %s2202_s21  ;;  %p96_p0 = scmp.ne.s32.totalorder %s2135_s17, %s2131_s16 }
   0xa   : > { %p87_p1 = scmp.eq.s32.totalorder %s86_s23, 0  ;;  %p97_p2 = scmp.eq.s32.totalorder %s2139_s18, 0 }
   0xb   : > { %p102_p3 = scmp.ne.s32.totalorder %s2131_s16, %s2127_s15  ;;  %p2717_p4 = scmp.eq.s32.totalorder %s2198_s19, 0 }
   0xc   : > { %s2214_s24 = scalar_select %p87_p1, %s2135_s17, %s89_s22  }
   0xd   : > { %p2216_p5 = por %p97_p2, %p96_p0  ;;  %p2222_p6 = por %p2717_p4, %p102_p3 }
   0xe   : > { %p126_p7 = scmp.eq.s32.totalorder %s2198_s19, 1  ;;  %p132_p8 = scmp.eq.s32.totalorder %s1499_s20, 1 }
   0xf   : > { %s2725_s25 = scalar_select %p2216_p5, 1, 0 }
  0x10   : > { %s2726_s26 = scalar_select %p2222_p6, 1, 0 }
  0x11   : > { %p1500_p9 = scmp.ge.s32.totalorder %s2139_s18, 1  ;;  %p139_p10 = scmp.lt.s32.totalorder %s2139_s18, 3 }
  0x12   : > { %p2229_p11 = por %p126_p7, %p96_p0  ;;  %p2233_p12 = por %p132_p8, %p102_p3 }
  0x13   : > { %p2237_p13 = pnand %p1500_p9, %p139_p10  ;;  %s2141_s30 = smov [#allocation2]  }
  0x14   : > { %s2727_s27 = scalar_select %p2229_p11, 1, 0 }
  0x15   : > { %s2728_s28 = scalar_select %p2233_p12, 1, 0 }
  0x16   : > { %s2729_s29 = scalar_select %p2237_p13, 1, 0 }
  0x17   : > { %p1917_p1 = pneg %p2237_p13  ;;  %s151_s5 = sshll.u32 %s2141_s30, 4  ;;  %s152_s5 = int_to_ptr.vmem [resolvable:$true] %s151_s5 }
  0x18   : > { %s2142_s7 = smov [#allocation5]   ;;  %s2731_s0 = sld [smem:[#allocation13_spill]] }
  0x19   : > { %p2245_p2 = pnand %p1917_p1, %p2717_p4  ;;  %s164_s8 = sshll.u32 %s2142_s7, 4  ;;  %s165_s8 = int_to_ptr.vmem [resolvable:$true] %s164_s8 }
  0x1b   : > { %p1981_p8 = pneg %p2245_p2 }
  0x1e   : > { %s1979_s11 = scalar_lea.hbm %s2731_s0, 768 }
  0x1f   : > { %p1980_p7 = scmp.ne.s32.totalorder %s2731_s0, %s1979_s11  ;;  %p1986_p1 = scmp.lt.u32.totalorder %s1979_s11, %s2731_s0 }
  0x21   : > { %p1982_p9 = pnand %p1981_p8, %p1980_p7 }
  0x23   : > { %p1983_p10 = pneg %p1982_p9 }
  0x25   : > { %p1988_p0 = pnand %p1986_p1, %p1983_p10 }
  0x27   : > { %1991 = shalt.err (!%p1988_p0)
}
  0x28   : > { %s1992_s22 = scalar_lea.vmem %s152_s5, 768  ;;  %p2000_p11 = scmp.lt.s32.totalorder %s152_s5, %s152_s5 }
  0x29   : > { %p1993_p4 = scmp.ne.s32.totalorder %s152_s5, %s1992_s22  ;;  %p2001_p6 = scmp.lt.s32.totalorder %s1992_s22, %s1992_s22 }
  0x2b   : > { %p1995_p3 = pnand %p1993_p4, %p1981_p8  ;;  %p2002_p13 = por %p2001_p6, %p2000_p11 }
  0x2d   : > { %p1996_p12 = pneg %p1995_p3 }
  0x2f   : > { %p2003_p5 = pnand %p2002_p13, %p1996_p12 }
  0x31   : > { %2006 = shalt.err (!%p2003_p5)
}
  0x32   : > { %s2722_s23 = smov 128   ;;  %s2723_s30 = smov 8  }
  0x33   : > { %1920 = dma.hbm_to_vmem [thread:$0]  (!%p2245_p2), %s2731_s0, 768, %s152_s5, [#allocation3], %s2722_s23, %s2722_s23, %s2723_s30  }
  0x34   : > { %p2732_p4 = scmp.ne.s32.totalorder %s2725_s25, 0  ;;  %p2733_p0 = scmp.lt.s32.totalorder %s2139_s18, 2 }
  0x35   : > { %s2007_s13 = scalar_lea.hbm %s2713_s1, 4096 }
  0x36   : > { %p2280_p3 = pnand %p2733_p0, %p2732_p4  ;;  %p2008_p5 = scmp.ne.s32.totalorder %s2713_s1, %s2007_s13 }
  0x37   : > { %p2014_p12 = scmp.lt.u32.totalorder %s2007_s13, %s2713_s1 }
  0x38   : > { %s2734_s10 = scalar_select %p2280_p3, 1, 0 }
  0x39   : > { %p2010_p6 = pnand %p2008_p5, %p1981_p8 }
  0x3b   : > { %p2011_p11 = pneg %p2010_p6 }
  0x3d   : > { %p2016_p13 = pnand %p2014_p12, %p2011_p11 }
  0x3f   : > { %2019 = shalt.err (!%p2016_p13)
}
  0x40   : > { %s2020_s22 = scalar_lea.vmem %s165_s8, 4096  ;;  %p2028_p1 = scmp.lt.s32.totalorder %s165_s8, %s165_s8 }
  0x41   : > { %p2021_p7 = scmp.ne.s32.totalorder %s165_s8, %s2020_s22  ;;  %p2029_p4 = scmp.lt.s32.totalorder %s2020_s22, %s2020_s22 }
  0x43   : > { %p2023_p9 = pnand %p2021_p7, %p1981_p8  ;;  %p2030_p0 = por %p2029_p4, %p2028_p1 }
  0x45   : > { %p2024_p10 = pneg %p2023_p9 }
  0x47   : > { %p2031_p3 = pnand %p2030_p0, %p2024_p10 }
  0x49   : > { %2034 = shalt.err (!%p2031_p3)
}
  0x4a   : > { %s2145_s7 = smov 256   ;;  %s2146_s9 = smov 16  }
  0x4b   : > { %1923 = dma.hbm_to_vmem [thread:$0]  (!%p2245_p2), %s2713_s1, 4096, %s165_s8, [#allocation6], %s2145_s7, %s2145_s7, %s2146_s9  }
  0x4c   : > { %s181_s13 = sand.u32 1, %s2139_s18   ;;  %s183_s14 = sand.u32 1, %s2135_s17  }
  0x4d   : > { %s1902_s20 = smul.u32 192, %s183_s14  ;;  %s2314_s6 = scalar_lea.sflag [#allocation3], %s181_s13 }
  0x4e   : > { %s1590_s5 = smul.u32 3072, %s2139_s18  ;;  %p2735_p8 = scmp.ne.s32.totalorder %s2734_s10, 0 }
  0x4f   : > { %s185_s30 = scalar_lea.vmem [#allocation7], %s1902_s20  ;;  %s2040_s11 = scalar_lea.hbm %s2715_s3, 6144 }
  0x50   : > { %s2310_s23 = scalar_lea.hbm %s2715_s3, %s1590_s5  ;;  %s192_s0 = sshll.u32 %s185_s30, 4  ;;  %s2312_s0 = int_to_ptr.vmem [resolvable:$true] %s192_s0 }
  0x51   : > { %s2035_s8 = scalar_lea.hbm %s2310_s23, 3072  ;;  %p2037_p3 = pneg %p2735_p8 }
  0x52   : > { %p2036_p2 = scmp.ne.s32.totalorder %s2310_s23, %s2035_s8  ;;  %p2041_p11 = scmp.lt.u32.totalorder %s2310_s23, %s2715_s3 }
  0x53   : > { %p2042_p12 = scmp.lt.u32.totalorder %s2040_s11, %s2035_s8  ;;  %p2044_p7 = scmp.lt.u32.totalorder %s2035_s8, %s2310_s23 }
  0x54   : > { %p2038_p5 = pnand %p2037_p3, %p2036_p2 }
  0x55   : > { %p2043_p13 = por %p2042_p12, %p2041_p11 }
  0x56   : > { %p2039_p6 = pneg %p2038_p5 }
  0x57   : > { %p2045_p9 = por %p2044_p7, %p2043_p13 }
  0x59   : > { %p2046_p10 = pnand %p2045_p9, %p2039_p6 }
  0x5b   : > { %2049 = shalt.err (!%p2046_p10)
}
  0x5c   : > { %s2050_s30 = scalar_lea.vmem %s2312_s0, 3072  ;;  %s2147_s13 = smov [#allocation7]  }
  0x5d   : > { %p2051_p1 = scmp.ne.s32.totalorder %s2312_s0, %s2050_s30  ;;  %s2055_s20 = sshll.u32 %s2147_s13, 4  ;;  %s2056_s20 = int_to_ptr.vmem [resolvable:$false] %s2055_s20 }
  0x5e   : > { %s2057_s5 = scalar_lea.vmem %s2056_s20, 6144  ;;  %p2058_p2 = scmp.lt.s32.totalorder %s2312_s0, %s2056_s20 }
  0x5f   : > { %p2053_p4 = pnand %p2051_p1, %p2037_p3  ;;  %p2059_p5 = scmp.lt.s32.totalorder %s2057_s5, %s2050_s30 }
  0x61   : > { %p2054_p0 = pneg %p2053_p4  ;;  %p2060_p11 = por %p2059_p5, %p2058_p2 }
  0x63   : > { %p2061_p12 = pnand %p2060_p11, %p2054_p0 }
  0x65   : > { %2064 = shalt.err (!%p2061_p12)
}
  0x66   : > { %s2736_s25 = smov 8   ;;  %s2737_s22 = smov 128  }
  0x67   : > { %1927 = dma.hbm_to_vmem [thread:$0]  (!%p2735_p8), %s2310_s23, 3072, %s2312_s0, %s2314_s6, %s2737_s22, %s2737_s22, %s2736_s25  }
  0x68   : > { %p2738_p3 = scmp.ne.s32.totalorder %s2729_s29, 0 }
  0x69   : > { %p2739_p6 = scmp.eq.s32.totalorder (!%p2738_p3), %s2198_s19, 0 }
  0x6a   : > { %204 = sbr.rel (%p2738_p3) target bundleno = 849 (0x351), region = 36 }
  0x71   : > { %2110 = dma.done.wait (%p2739_p6), [#allocation3], 768   ;;  %p2740_p13 = pmov %p2739_p6 }
  0x72   : > { %p2741_p7 = pmov %p2739_p6 }
  0x73   : > { %2112 = vsyncadd (%p2740_p13), [#allocation3], 4294966528 }
  0x74   : > { %2114 = dma.done.wait (%p2741_p7), [#allocation6], 4096   ;;  %p2742_p9 = pmov %p2739_p6 }
  0x75   : > { %s214_s10 = sand.u32 1, %s2198_s19   ;;  %s2357_s0 = sand.u32 1, %s2131_s16  }
  0x76   : > { %2116 = vsyncadd (%p2742_p9), [#allocation6], 4294963200  ;;  %s1903_s29 = smul.u32 192, %s2357_s0  ;;  %s215_s23 = scalar_lea.sflag [#allocation3], %s214_s10 }
  0x77   : > { %p2743_p8 = scmp.ne.s32.totalorder %s2726_s26, 0 }
  0x78   : > { %s2360_s6 = scalar_lea.vmem [#allocation7], %s1903_s29 }
  0x79   : > { %2118 = dma.done.wait (%p2743_p8), %s215_s23, 3072  }
  0x7a   : > { %2120 = vsyncadd (%p2743_p8), %s215_s23, 4294964224  ;;  %v245_v0 = vld [vmem:[%s2360_s6] sm:$0xff]  ;;  %v246_v1 = vld [vmem:[%s2360_s6 + $0x8] sm:$0xff]  ;;  %vm257_vm0 = vcmask 392192   ;;  %s1904_s7 = smul.u32 384, %s2357_s0  ;;  %p2744_p1 = scmp.ne.s32.totalorder %s2727_s27, 0 }
  0x7b   : > { %v247_v2 = vld [vmem:[%s2360_s6 + $0x10] sm:$0xff]  ;;  %v1726_v3 = vpack.c.bf16 %v246_v1, %v245_v0  ;;  %v248_v4 = vld [vmem:[%s2360_s6 + $0x18] sm:$0xff]  ;;  %v249_v6 = vld [vmem:[%s2360_s6 + $0x20] sm:$0xff]  ;;  %s1593_s5 = smul.u32 6144, %s2198_s19  ;;  %s1390_s19 = scalar_lea.sflag [#allocation4], %s2357_s0 }
  0x7c   : > { %v1730_v5 = vpack.c.bf16 %v248_v4, %v247_v2  ;;  %v250_v7 = vld [vmem:[%s2360_s6 + $0x28] sm:$0xff]  ;;  %v2372_v8 = vld [vmem:[#allocation2] sm:$0xff]  ;;  %v374_v10 = vld [vmem:[#allocation5 + $0x18] sm:$0xff]  ;;  %s2570_s9 = scalar_lea.vmem [#allocation8], %s1904_s7 }
  0x7d   : > { %1727 = vmatprep.subr.bf16.mxu0 %v1726_v3  ;;  %1654 = vmatprep.mubr.msk.f32.mxu0 %vm257_vm0, %v2372_v8  ;;  %v372_v9 = vld [vmem:[#allocation5 + $0x8] sm:$0xff]  ;;  %v371_v11 = vld [vmem:[#allocation5] sm:$0xff]  ;;  %v1734_v12 = vpack.c.bf16 %v250_v7, %v249_v6  ;;  %v373_v14 = vld [vmem:[#allocation5 + $0x10] sm:$0xff]  ;;  %s1404_s25 = sshll.u32 %s2570_s9, 4  ;;  %s2664_s29 = scalar_lea.hbm %s2716_s4, %s1593_s5  ;;  %s2666_s25 = int_to_ptr.vmem [resolvable:$true] %s1404_s25 }
  0x7e   : > { %1729 = vmatpush3.bf16.msra.mxu0 %v1726_v3  ;;  %v2376_v13 = vpack.c.bf16 %v374_v10, %v372_v9  ;;  %v376_v15 = vld [vmem:[#allocation5 + $0x28] sm:$0xff]  ;;  %v378_v16 = vld [vmem:[#allocation5 + $0x38] sm:$0xff]  ;;  %v2378_v17 = vpack.c.bf16 %v373_v14, %v371_v11  ;;  %v375_v19 = vld [vmem:[#allocation5 + $0x20] sm:$0xff]  ;;  %v2148_v9 = vmov 0.0   ;;  %s2065_s23 = scalar_lea.vmem %s2666_s25, 6144 }
  0x7f   : > { %1731 = vmatprep.subr.bf16.mxu0 %v1730_v5  ;;  %v2380_v18 = vpack.c.bf16 %v378_v16, %v376_v15  ;;  %v377_v20 = vld [vmem:[#allocation5 + $0x30] sm:$0xff]  ;;  %v380_v21 = vld [vmem:[#allocation5 + $0x48] sm:$0xff]  ;;  %v382_v22 = vld [vmem:[#allocation5 + $0x58] sm:$0xff]  ;;  %479 = vmatprep.mubr.f32.mxu1 %v2148_v9  ;;  %p2066_p10 = scmp.ne.s32.totalorder %s2666_s25, %s2065_s23 }
  0x80   : > { %1739 = vmatprep.subr.bf16.mxu1 %v2376_v13  ;;  %v2384_v23 = vpack.c.bf16 %v377_v20, %v375_v19  ;;  %v379_v24 = vld [vmem:[#allocation5 + $0x40] sm:$0xff]  ;;  %v2387_v25 = vpack.c.bf16 %v382_v22, %v380_v21  ;;  %v381_v26 = vld [vmem:[#allocation5 + $0x50] sm:$0xff]  ;;  %v1515_v28 = vld [vmem:[%s2360_s6 + $0x38] sm:$0xff] }
  0x81   : > { %1741 = vmatpush1.bf16.msra.mxu1 %v2378_v17  ;;  %v1514_v27 = vld [vmem:[%s2360_s6 + $0x30] sm:$0xff]  ;;  %v384_v29 = vld [vmem:[#allocation5 + $0x68] sm:$0xff]  ;;  %v386_v30 = vld [vmem:[#allocation5 + $0x78] sm:$0xff]  ;;  %v2396_v35 = vpack.c.bf16 %v381_v26, %v379_v24  ;;  %p2067_p4 = pnand %p2066_p10, %p2744_p1 }
  0x82   : > { %1733 = vmatpush3.bf16.msra.mxu0 %v1730_v5  ;;  %1743 = vmatprep.subr.bf16.mxu1 %v2380_v18  ;;  %v1770_v31 = vpack.c.bf16 %v1515_v28, %v1514_v27  ;;  %v1516_v32 = vld [vmem:[%s2360_s6 + $0x40] sm:$0xff]  ;;  %v1517_v33 = vld [vmem:[%s2360_s6 + $0x48] sm:$0xff]  ;;  %v2393_v34 = vld [vmem:[#allocation2 + $0x8] sm:$0xff]  ;;  %v2401_v37 = vpack.c.bf16 %v386_v30, %v384_v29 }
  0x83   : > { %1735 = vmatprep.subr.bf16.mxu0 %v1734_v12  ;;  %v2398_v36 = vld [vmem:[#allocation2 + $0x10] sm:$0xff]  ;;  %v385_v39 = vld [vmem:[#allocation5 + $0x70] sm:$0xff]  ;;  %v388_v40 = vld [vmem:[#allocation5 + $0x88] sm:$0xff]  ;;  %v1774_v42 = vpack.c.bf16 %v1517_v33, %v1516_v32  ;;  %p2068_p0 = pneg %p2067_p4 }
  0x84   : > { %v383_v38 = vld [vmem:[#allocation5 + $0x60] sm:$0xff]  ;;  %v390_v41 = vld [vmem:[#allocation5 + $0x98] sm:$0xff]  ;;  %v1518_v43 = vld [vmem:[%s2360_s6 + $0x50] sm:$0xff] }
  0x85   : > { %1745 = vmatpush1.bf16.msra.mxu1 %v2384_v23  ;;  %v1519_v44 = vld [vmem:[%s2360_s6 + $0x58] sm:$0xff]  ;;  %v2409_v45 = vld [vmem:[#allocation2 + $0x18] sm:$0xff]  ;;  %v2412_v46 = vpack.c.bf16 %v385_v39, %v383_v38  ;;  %v2414_v47 = vld [vmem:[#allocation2 + $0x20] sm:$0xff]  ;;  %v2417_v48 = vpack.c.bf16 %v390_v41, %v388_v40 }
  0x86   : > { %1737 = vmatpush3.bf16.msra.mxu0 %v1734_v12  ;;  %1747 = vmatprep.subr.bf16.mxu1 %v2387_v25  ;;  %v387_v49 = vld [vmem:[#allocation5 + $0x80] sm:$0xff]  ;;  %v389_v50 = vld [vmem:[#allocation5 + $0x90] sm:$0xff]  ;;  %v392_v51 = vld [vmem:[#allocation5 + $0xa8] sm:$0xff]  ;;  %v1778_v53 = vpack.c.bf16 %v1519_v44, %v1518_v43 }
  0x87   : > { %1771 = vmatprep.subr.bf16.mxu0 %v1770_v31  ;;  %v394_v52 = vld [vmem:[#allocation5 + $0xb8] sm:$0xff]  ;;  %v2426_v55 = vpack.c.bf16 %v389_v50, %v387_v49  ;;  %v391_v57 = vld [vmem:[#allocation5 + $0xa0] sm:$0xff]  ;;  %v393_v58 = vld [vmem:[#allocation5 + $0xb0] sm:$0xff] }
  0x88   : > { %v2423_v54 = vld [vmem:[#allocation2 + $0x28] sm:$0xff]  ;;  %v2429_v56 = vpack.c.bf16 %v394_v52, %v392_v51  ;;  %v396_v59 = vld [vmem:[#allocation5 + $0xc8] sm:$0xff]  ;;  %v2434_v61 = vpack.c.bf16 %v393_v58, %v391_v57  ;;  %v395_v63 = vld [vmem:[#allocation5 + $0xc0] sm:$0xff] }
  0x89   : > { %1655 = vmatmul.mubr.msk.f32.vlgmr.msra.gmra.mrb[0].mxu0 %vm257_vm0, %v2393_v34  ;;  %1749 = vmatpush1.bf16.msra.mxu1 %v2396_v35  ;;  %v398_v60 = vld [vmem:[#allocation5 + $0xd8] sm:$0xff]  ;;  %v397_v0 = vld [vmem:[#allocation5 + $0xd0] sm:$0xff]  ;;  %v400_v1 = vld [vmem:[#allocation5 + $0xe8] sm:$0xff] }
  0x8a   : > { %1657 = vmatprep.mubr.msk.f32.mxu0 %vm257_vm0, %v2398_v36  ;;  %1751 = vmatprep.subr.bf16.mxu1 %v2401_v37  ;;  %v2439_v62 = vpack.c.bf16 %v398_v60, %v396_v59  ;;  %v402_v2 = vld [vmem:[#allocation5 + $0xf8] sm:$0xff]  ;;  %v2443_v3 = vpack.c.bf16 %v397_v0, %v395_v63  ;;  %v399_v5 = vld [vmem:[#allocation5 + $0xe0] sm:$0xff]  ;;  %v401_v6 = vld [vmem:[#allocation5 + $0xf0] sm:$0xff] }
  0x8b   : > { %1773 = vmatpush3.bf16.msra.mxu0 %v1770_v31  ;;  %v2448_v4 = vpack.c.bf16 %v402_v2, %v400_v1  ;;  %v2455_v7 = vpack.c.bf16 %v401_v6, %v399_v5  ;;  %v1538_v10 = vld [vmem:[%s2360_s6 + $0x60] sm:$0xff]  ;;  %v1539_v11 = vld [vmem:[%s2360_s6 + $0x68] sm:$0xff]  ;;  %v1540_v14 = vld [vmem:[%s2360_s6 + $0x70] sm:$0xff] }
  0x8c   : > { %1775 = vmatprep.subr.bf16.mxu0 %v1774_v42  ;;  %v1814_v12 = vpack.c.bf16 %v1539_v11, %v1538_v10  ;;  %v1541_v15 = vld [vmem:[%s2360_s6 + $0x78] sm:$0xff]  ;;  %v1542_v21 = vld [vmem:[%s2360_s6 + $0x80] sm:$0xff]  ;;  %v1543_v22 = vld [vmem:[%s2360_s6 + $0x88] sm:$0xff] }
  0x8d   : > { %1658 = vmatmul.mubr.msk.f32.gmra.mrb[2].mxu0 %vm257_vm0, %v2409_v45  ;;  %1753 = vmatpush1.bf16.msra.mxu1 %v2412_v46  ;;  %v1818_v19 = vpack.c.bf16 %v1541_v15, %v1540_v14  ;;  %v1822_v26 = vpack.c.bf16 %v1543_v22, %v1542_v21  ;;  %v1562_v28 = vld [vmem:[%s2360_s6 + $0x90] sm:$0xff]  ;;  %v1563_v29 = vld [vmem:[%s2360_s6 + $0x98] sm:$0xff]  ;;  %v1564_v39 = vld [vmem:[%s2360_s6 + $0xa0] sm:$0xff] }
  0x8e   : > { %1660 = vmatprep.mubr.msk.f32.mxu0 %vm257_vm0, %v2414_v47  ;;  %1755 = vmatprep.subr.bf16.mxu1 %v2417_v48  ;;  %v1858_v31 = vpack.c.bf16 %v1563_v29, %v1562_v28  ;;  %v1565_v40 = vld [vmem:[%s2360_s6 + $0xa8] sm:$0xff]  ;;  %v1567_v43 = vld [vmem:[%s2360_s6 + $0xb8] sm:$0xff] }
  0x8f   : > { %1777 = vmatpush3.bf16.msra.mxu0 %v1774_v42  ;;  %v1862_v41 = vpack.c.bf16 %v1565_v40, %v1564_v39  ;;  %v1566_v42 = vld [vmem:[%s2360_s6 + $0xb0] sm:$0xff]  ;;  %s2149_s6 = smov [#allocation8]  }
  0x90   : > { %1779 = vmatprep.subr.bf16.mxu0 %v1778_v53  ;;  %v1866_v44 = vpack.c.bf16 %v1567_v43, %v1566_v42  ;;  %s2069_s26 = sshll.u32 %s2149_s6, 4  ;;  %s2070_s26 = int_to_ptr.vmem [resolvable:$false] %s2069_s26 }
  0x91   : > { %1661 = vmatmul.mubr.msk.f32.gmra.mrb[4].mxu0 %vm257_vm0, %v2423_v54  ;;  %1757 = vmatpush1.bf16.msra.mxu1 %v2426_v55  ;;  %s2071_s8 = scalar_lea.vmem %s2070_s26, 12288  ;;  %p2072_p2 = scmp.lt.s32.totalorder %s2666_s25, %s2070_s26 }
  0x92   : > { %1675 = vmatprep.mubr.msk.f32.mxu0 %vm257_vm0, %v2372_v8  ;;  %1759 = vmatprep.subr.bf16.mxu1 %v2429_v56  ;;  %p2073_p5 = scmp.lt.s32.totalorder %s2071_s8, %s2065_s23 }
  0x93   : > { %1781 = vmatpush3.bf16.msra.mxu0 %v1778_v53 }
  0x94   : > { %1783 = vmatprep.subr.bf16.mxu0 %v2376_v13  ;;  %p2074_p11 = por %p2073_p5, %p2072_p2 }
  0x95   : > { %1761 = vmatpush1.bf16.msra.mxu1 %v2434_v61 }
  0x96   : > { %1676 = vmatmul.mubr.msk.f32.vlgmr.msra.gmra.mrb[6].mxu0 %vm257_vm0, %v2393_v34  ;;  %1763 = vmatprep.subr.bf16.mxu1 %v2439_v62  ;;  %p2075_p12 = pnand %p2074_p11, %p2068_p0 }
  0x97   : > { %1678 = vmatprep.mubr.msk.f32.mxu0 %vm257_vm0, %v2398_v36  ;;  %1785 = vmatpush1.bf16.msra.mxu0 %v2378_v17 }
  0x98   : > { %1787 = vmatprep.subr.bf16.mxu0 %v2380_v18 }
  0x99   : > { %1765 = vmatpush1.bf16.msra.mxu1 %v2443_v3 }
  0x9a   : > { %1679 = vmatmul.mubr.msk.f32.gmra.mrb[8].mxu0 %vm257_vm0, %v2409_v45  ;;  %1767 = vmatprep.subr.bf16.mxu1 %v2448_v4 }
  0x9b   : > { %1681 = vmatprep.mubr.msk.f32.mxu0 %vm257_vm0, %v2414_v47  ;;  %1789 = vmatpush1.bf16.msra.mxu0 %v2384_v23 }
  0x9c   : > { %1791 = vmatprep.subr.bf16.mxu0 %v2387_v25 }
  0x9d   : > { %1769 = vmatpush1.bf16.msra.mxu1 %v2455_v7 }
  0x9e   : > { %1682 = vmatmul.mubr.msk.f32.gmra.mrb[10].mxu0 %vm257_vm0, %v2423_v54  ;;  %1815 = vmatprep.subr.bf16.mxu1 %v1814_v12 }
  0x9f   : > { %1793 = vmatpush1.bf16.msra.mxu0 %v2396_v35  ;;  %765 = vmatprep.mubr.f32.mxu0 %v2148_v9 }
  0xa0   : > { %1795 = vmatprep.subr.bf16.mxu0 %v2401_v37 }
  0xa3   : > { %1797 = vmatpush1.bf16.msra.mxu0 %v2412_v46 }
  0xa4   : > { %1799 = vmatprep.subr.bf16.mxu0 %v2417_v48 }
  0xa7   : > { %1801 = vmatpush1.bf16.msra.mxu0 %v2426_v55 }
  0xa8   : > { %1803 = vmatprep.subr.bf16.mxu0 %v2429_v56 }
  0xab   : > { %1805 = vmatpush1.bf16.msra.mxu0 %v2434_v61 }
  0xac   : > { %1807 = vmatprep.subr.bf16.mxu0 %v2439_v62 }
  0xaf   : > { %1809 = vmatpush1.bf16.msra.mxu0 %v2443_v3 }
  0xb0   : > { %1811 = vmatprep.subr.bf16.mxu0 %v2448_v4 }
  0xb3   : > { %1813 = vmatpush1.bf16.msra.mxu0 %v2455_v7 }
  0xb4   : > { %1827 = vmatprep.subr.bf16.mxu0 %v2376_v13 }
 0x15c   : > { %v1656_v16 = vpop.f32.mrb[0].mxu0 }
 0x15d   : > { %v342_v20 = vpop.f32.mrb[1].mxu0 }
 0x15e   : > { %480 = vmatmul.mubr.f32.vlgmr.msra.gmra.mrb[0].mxu1 %v342_v20 }
 0x15f   : > { %1817 = vmatpush3.bf16.msra.mxu1 %v1814_v12  ;;  %485 = vmatprep.mubr.f32.mxu1 %v2148_v9 }
 0x160   : > { %v1659_v24 = vpop.f32.mrb[2].mxu0  ;;  %1819 = vmatprep.subr.bf16.mxu1 %v1818_v19 }
 0x161   : > { %v352_v27 = vpop.f32.mrb[3].mxu0 }
 0x162   : > { %486 = vmatmul.mubr.f32.gmra.mrb[2].mxu1 %v1656_v16 }
 0x163   : > { %491 = vmatprep.mubr.f32.mxu1 %v2148_v9  ;;  %1821 = vmatpush3.bf16.msra.mxu1 %v1818_v19 }
 0x164   : > { %v1662_v30 = vpop.f32.mrb[4].mxu0  ;;  %1823 = vmatprep.subr.bf16.mxu1 %v1822_v26 }
 0x165   : > { %v362_v32 = vpop.f32.mrb[5].mxu0 }
 0x166   : > { %492 = vmatmul.mubr.f32.gmra.mrb[4].mxu1 %v352_v27 }
 0x167   : > { %497 = vmatprep.mubr.f32.mxu1 %v2148_v9  ;;  %1825 = vmatpush3.bf16.msra.mxu1 %v1822_v26 }
 0x168   : > { %1859 = vmatprep.subr.bf16.mxu1 %v1858_v31 }
 0x169   : > { %v1677_v33 = vpop.f32.mrb[6].mxu0 }
 0x16a   : > { %498 = vmatmul.mubr.f32.gmra.mrb[6].mxu1 %v1659_v24  ;;  %v628_v38 = vpop.f32.mrb[7].mxu0 }
 0x16b   : > { %503 = vmatprep.mubr.f32.mxu1 %v2148_v9  ;;  %766 = vmatmul.mubr.f32.vlgmr.msra.gmra.mrb[12].mxu0 %v628_v38 }
 0x16c   : > { %1829 = vmatpush1.bf16.msra.mxu0 %v2378_v17  ;;  %771 = vmatprep.mubr.f32.mxu0 %v2148_v9 }
 0x16d   : > { %1831 = vmatprep.subr.bf16.mxu0 %v2380_v18 }
 0x16e   : > { %504 = vmatmul.mubr.f32.gmra.mrb[8].mxu1 %v362_v32 }
 0x16f   : > { %509 = vmatprep.mubr.f32.mxu1 %v2148_v9  ;;  %772 = vmatmul.mubr.f32.gmra.mrb[14].mxu0 %v1677_v33 }
 0x170   : > { %1833 = vmatpush1.bf16.msra.mxu0 %v2384_v23  ;;  %777 = vmatprep.mubr.f32.mxu0 %v2148_v9 }
 0x171   : > { %1835 = vmatprep.subr.bf16.mxu0 %v2387_v25 }
 0x172   : > { %510 = vmatmul.mubr.f32.gmra.mrb[10].mxu1 %v1662_v30 }
 0x173   : > { %1696 = vmatprep.mubr.msk.f32.mxu1 %vm257_vm0, %v2372_v8 }
 0x174   : > { %1837 = vmatpush1.bf16.msra.mxu0 %v2396_v35 }
 0x175   : > { %1839 = vmatprep.subr.bf16.mxu0 %v2401_v37 }
 0x176   : > { %1697 = vmatmul.mubr.msk.f32.vlgmr.msra.gmra.mrb[12].mxu1 %vm257_vm0, %v2393_v34 }
 0x177   : > { %1861 = vmatpush3.bf16.msra.mxu1 %v1858_v31  ;;  %1699 = vmatprep.mubr.msk.f32.mxu1 %vm257_vm0, %v2398_v36 }
 0x178   : > { %1863 = vmatprep.subr.bf16.mxu1 %v1862_v41  ;;  %1841 = vmatpush1.bf16.msra.mxu0 %v2412_v46 }
 0x179   : > { %1843 = vmatprep.subr.bf16.mxu0 %v2417_v48 }
 0x17a   : > { %1700 = vmatmul.mubr.msk.f32.gmra.mrb[14].mxu1 %vm257_vm0, %v2409_v45 }
 0x17b   : > { %1865 = vmatpush3.bf16.msra.mxu1 %v1862_v41  ;;  %1702 = vmatprep.mubr.msk.f32.mxu1 %vm257_vm0, %v2414_v47 }
 0x17c   : > { %1867 = vmatprep.subr.bf16.mxu1 %v1866_v44  ;;  %1845 = vmatpush1.bf16.msra.mxu0 %v2426_v55 }
 0x17d   : > { %1847 = vmatprep.subr.bf16.mxu0 %v2429_v56 }
 0x17e   : > { %1703 = vmatmul.mubr.msk.f32.gmra.mrb[16].mxu1 %vm257_vm0, %v2423_v54 }
 0x17f   : > { %1869 = vmatpush3.bf16.msra.mxu1 %v1866_v44  ;;  %1717 = vmatprep.mubr.msk.f32.mxu1 %vm257_vm0, %v2372_v8  ;;  %v1680_v8 = vpop.f32.mrb[8].mxu0 }
 0x180   : > { %1871 = vmatprep.subr.bf16.mxu1 %v2376_v13  ;;  %1849 = vmatpush1.bf16.msra.mxu0 %v2434_v61  ;;  %v638_v13 = vpop.f32.mrb[9].mxu0 }
 0x181   : > { %1851 = vmatprep.subr.bf16.mxu0 %v2439_v62  ;;  %778 = vmatmul.mubr.f32.gmra.mrb[16].mxu0 %v638_v13 }
 0x182   : > { %1718 = vmatmul.mubr.msk.f32.vlgmr.msra.gmra.mrb[18].mxu1 %vm257_vm0, %v2393_v34  ;;  %783 = vmatprep.mubr.f32.mxu0 %v2148_v9 }
 0x183   : > { %1720 = vmatprep.mubr.msk.f32.mxu1 %vm257_vm0, %v2398_v36  ;;  %1873 = vmatpush1.bf16.msra.mxu1 %v2378_v17  ;;  %v1683_v17 = vpop.f32.mrb[10].mxu0 }
 0x184   : > { %1875 = vmatprep.subr.bf16.mxu1 %v2380_v18  ;;  %1853 = vmatpush1.bf16.msra.mxu0 %v2443_v3  ;;  %v648_v18 = vpop.f32.mrb[11].mxu0 }
 0x185   : > { %1855 = vmatprep.subr.bf16.mxu0 %v2448_v4  ;;  %784 = vmatmul.mubr.f32.gmra.mrb[18].mxu0 %v1680_v8 }
 0x186   : > { %1721 = vmatmul.mubr.msk.f32.gmra.mrb[20].mxu1 %vm257_vm0, %v2409_v45  ;;  %789 = vmatprep.mubr.f32.mxu0 %v2148_v9 }
 0x187   : > { %1723 = vmatprep.mubr.msk.f32.mxu1 %vm257_vm0, %v2414_v47  ;;  %1877 = vmatpush1.bf16.msra.mxu1 %v2384_v23  ;;  %v405_v23 = vlaneseq }
 0x188   : > { %1879 = vmatprep.subr.bf16.mxu1 %v2387_v25  ;;  %1857 = vmatpush1.bf16.msra.mxu0 %v2455_v7 }
 0x189   : > { %790 = vmatmul.mubr.f32.gmra.mrb[20].mxu0 %v648_v18  ;;  %v406_v25 = vshrl.u32 %v405_v23, 7 }
 0x18a   : > { %1724 = vmatmul.mubr.msk.f32.gmra.mrb[22].mxu1 %vm257_vm0, %v2423_v54  ;;  %795 = vmatprep.mubr.f32.mxu0 %v2148_v9  ;;  %v689_v54 = vld [vmem:[%s2714_s2] sm:$0x3] }
 0x18b   : > { %1881 = vmatpush1.bf16.msra.mxu1 %v2396_v35  ;;  %1337 = vmatprep.mubr.f32.mxu1 %v2148_v9  ;;  %v2560_v34 = vsub.s32 0, %v406_v25  ;;  %v403_v35 = vld [vmem:[%s2714_s2] sm:$0x3]  ;;  %v2565_v36 = vsub.s32 1, %v406_v25 }
 0x18c   : > { %1883 = vmatprep.subr.bf16.mxu1 %v2401_v37 }
 0x18d   : > { %796 = vmatmul.mubr.f32.gmra.mrb[22].mxu0 %v1683_v17  ;;  %v408_v37 = vrot.slane %v403_v35, %v2560_v34  ;;  %v412_v45 = vrot.slane %v403_v35, %v2565_v36  ;;  %v2580_v59 = vrot.slane %v689_v54, %v2560_v34  ;;  %v2584_v60 = vrot.slane %v689_v54, %v2565_v36 }
 0x18e   : > { %1051 = vmatprep.mubr.f32.mxu0 %v2148_v9 }
 0x18f   : > { %1885 = vmatpush1.bf16.msra.mxu1 %v2412_v46 }
 0x190   : > { %1887 = vmatprep.subr.bf16.mxu1 %v2417_v48 }
 0x193   : > { %1889 = vmatpush1.bf16.msra.mxu1 %v2426_v55 }
 0x194   : > { %1891 = vmatprep.subr.bf16.mxu1 %v2429_v56 }
 0x197   : > { %1893 = vmatpush1.bf16.msra.mxu1 %v2434_v61 }
 0x198   : > { %1895 = vmatprep.subr.bf16.mxu1 %v2439_v62 }
 0x19b   : > { %1897 = vmatpush1.bf16.msra.mxu1 %v2443_v3 }
 0x19c   : > { %1899 = vmatprep.subr.bf16.mxu1 %v2448_v4 }
 0x19f   : > { %1901 = vmatpush1.bf16.msra.mxu1 %v2455_v7 }
 0x231   : > { %v481_v46 = vpop.f32.mrb[0].mxu1 }
 0x232   : > { %v482_v47 = vadd.f32 %v481_v46, %v408_v37  ;;  %v483_v48 = vpop.f32.mrb[1].mxu1 }
 0x233   : > { %v484_v49 = vadd.f32 %v483_v48, %v412_v45 }
 0x234   : > { %519 = vst [vmem:[%s2570_s9] sm:$0xff] %v482_v47  ;;  %v975_v47 = vld [vmem:[%s2714_s2] sm:$0x3] }
 0x235   : > { %520 = vst [vmem:[%s2570_s9 + $0x8] sm:$0xff] %v484_v49  ;;  %v487_v50 = vpop.f32.mrb[2].mxu1  ;;  %v980_v48 = vrot.slane %v975_v47, %v2560_v34  ;;  %v984_v49 = vrot.slane %v975_v47, %v2565_v36 }
 0x236   : > { %v488_v51 = vadd.f32 %v487_v50, %v408_v37  ;;  %v489_v52 = vpop.f32.mrb[3].mxu1 }
 0x237   : > { %v490_v53 = vadd.f32 %v489_v52, %v412_v45 }
 0x238   : > { %521 = vst [vmem:[%s2570_s9 + $0x10] sm:$0xff] %v488_v51 }
 0x239   : > { %522 = vst [vmem:[%s2570_s9 + $0x18] sm:$0xff] %v490_v53  ;;  %v493_v55 = vpop.f32.mrb[4].mxu1 }
 0x23a   : > { %v494_v56 = vadd.f32 %v493_v55, %v408_v37  ;;  %v495_v57 = vpop.f32.mrb[5].mxu1 }
 0x23b   : > { %v496_v58 = vadd.f32 %v495_v57, %v412_v45 }
 0x23c   : > { %523 = vst [vmem:[%s2570_s9 + $0x20] sm:$0xff] %v494_v56 }
 0x23d   : > { %524 = vst [vmem:[%s2570_s9 + $0x28] sm:$0xff] %v496_v58  ;;  %v499_v61 = vpop.f32.mrb[6].mxu1  ;;  %v1261_v58 = vld [vmem:[%s2714_s2] sm:$0x3] }
 0x23e   : > { %v500_v62 = vadd.f32 %v499_v61, %v408_v37  ;;  %v501_v63 = vpop.f32.mrb[7].mxu1  ;;  %v767_v0 = vpop.f32.mrb[12].mxu0 }
 0x23f   : > { %v502_v1 = vadd.f32 %v501_v63, %v412_v45  ;;  %v768_v2 = vadd.f32 %v767_v0, %v2580_v59  ;;  %v769_v3 = vpop.f32.mrb[13].mxu0  ;;  %v1270_v0 = vrot.slane %v1261_v58, %v2565_v36 }
 0x240   : > { %525 = vst [vmem:[%s2570_s9 + $0x30] sm:$0xff] %v500_v62  ;;  %v770_v4 = vadd.f32 %v769_v3, %v2584_v60  ;;  %v1266_v62 = vrot.slane %v1261_v58, %v2560_v34 }
 0x241   : > { %526 = vst [vmem:[%s2570_s9 + $0x38] sm:$0xff] %v502_v1  ;;  %v505_v5 = vpop.f32.mrb[8].mxu1  ;;  %1526 = vst [vmem:[%s2570_s9 + $0x60] sm:$0xff] %v768_v2 }
 0x242   : > { %v506_v6 = vadd.f32 %v505_v5, %v408_v37  ;;  %v507_v7 = vpop.f32.mrb[9].mxu1  ;;  %1527 = vst [vmem:[%s2570_s9 + $0x68] sm:$0xff] %v770_v4  ;;  %v773_v10 = vpop.f32.mrb[14].mxu0 }
 0x243   : > { %v508_v11 = vadd.f32 %v507_v7, %v412_v45  ;;  %v774_v12 = vadd.f32 %v773_v10, %v2580_v59  ;;  %v775_v14 = vpop.f32.mrb[15].mxu0 }
 0x244   : > { %527 = vst [vmem:[%s2570_s9 + $0x40] sm:$0xff] %v506_v6  ;;  %v776_v15 = vadd.f32 %v775_v14, %v2584_v60 }
 0x245   : > { %528 = vst [vmem:[%s2570_s9 + $0x48] sm:$0xff] %v508_v11  ;;  %v511_v16 = vpop.f32.mrb[10].mxu1  ;;  %1528 = vst [vmem:[%s2570_s9 + $0x70] sm:$0xff] %v774_v12 }
 0x246   : > { %v512_v19 = vadd.f32 %v511_v16, %v408_v37  ;;  %v513_v20 = vpop.f32.mrb[11].mxu1  ;;  %1529 = vst [vmem:[%s2570_s9 + $0x78] sm:$0xff] %v776_v15 }
 0x247   : > { %v514_v21 = vadd.f32 %v513_v20, %v412_v45 }
 0x248   : > { %529 = vst [vmem:[%s2570_s9 + $0x50] sm:$0xff] %v512_v19 }
 0x249   : > { %530 = vst [vmem:[%s2570_s9 + $0x58] sm:$0xff] %v514_v21  ;;  %v1698_v22 = vpop.f32.mrb[12].mxu1 }
 0x24a   : > { %v914_v24 = vpop.f32.mrb[13].mxu1 }
 0x24b   : > { %1052 = vmatmul.mubr.f32.vlgmr.msra.gmra.mrb[24].mxu0 %v914_v24 }
 0x24c   : > { %1057 = vmatprep.mubr.f32.mxu0 %v2148_v9 }
 0x24d   : > { %v1701_v26 = vpop.f32.mrb[14].mxu1 }
 0x24e   : > { %v924_v27 = vpop.f32.mrb[15].mxu1 }
 0x24f   : > { %1058 = vmatmul.mubr.f32.gmra.mrb[26].mxu0 %v1698_v22 }
 0x250   : > { %1063 = vmatprep.mubr.f32.mxu0 %v2148_v9 }
 0x251   : > { %v1704_v28 = vpop.f32.mrb[16].mxu1 }
 0x252   : > { %v934_v29 = vpop.f32.mrb[17].mxu1 }
 0x253   : > { %1064 = vmatmul.mubr.f32.gmra.mrb[28].mxu0 %v924_v27 }
 0x254   : > { %1069 = vmatprep.mubr.f32.mxu0 %v2148_v9  ;;  %v779_v40 = vpop.f32.mrb[16].mxu0 }
 0x255   : > { %v1719_v30 = vpop.f32.mrb[18].mxu1  ;;  %v780_v41 = vadd.f32 %v779_v40, %v2580_v59  ;;  %v781_v42 = vpop.f32.mrb[17].mxu0 }
 0x256   : > { %v1200_v31 = vpop.f32.mrb[19].mxu1  ;;  %v782_v43 = vadd.f32 %v781_v42, %v2584_v60 }
 0x257   : > { %1070 = vmatmul.mubr.f32.gmra.mrb[30].mxu0 %v1701_v26  ;;  %1338 = vmatmul.mubr.f32.vlgmr.msra.gmra.mrb[24].mxu1 %v1200_v31  ;;  %1530 = vst [vmem:[%s2570_s9 + $0x80] sm:$0xff] %v780_v41 }
 0x258   : > { %1075 = vmatprep.mubr.f32.mxu0 %v2148_v9  ;;  %1343 = vmatprep.mubr.f32.mxu1 %v2148_v9  ;;  %1531 = vst [vmem:[%s2570_s9 + $0x88] sm:$0xff] %v782_v43  ;;  %v785_v44 = vpop.f32.mrb[18].mxu0 }
 0x259   : > { %v1722_v32 = vpop.f32.mrb[20].mxu1  ;;  %v786_v8 = vadd.f32 %v785_v44, %v2580_v59  ;;  %v787_v13 = vpop.f32.mrb[19].mxu0 }
 0x25a   : > { %v1210_v33 = vpop.f32.mrb[21].mxu1  ;;  %v788_v17 = vadd.f32 %v787_v13, %v2584_v60 }
 0x25b   : > { %1076 = vmatmul.mubr.f32.gmra.mrb[32].mxu0 %v934_v29  ;;  %1344 = vmatmul.mubr.f32.gmra.mrb[26].mxu1 %v1719_v30  ;;  %1532 = vst [vmem:[%s2570_s9 + $0x90] sm:$0xff] %v786_v8 }
 0x25c   : > { %1081 = vmatprep.mubr.f32.mxu0 %v2148_v9  ;;  %1349 = vmatprep.mubr.f32.mxu1 %v2148_v9  ;;  %1533 = vst [vmem:[%s2570_s9 + $0x98] sm:$0xff] %v788_v17 }
 0x25d   : > { %v1725_v38 = vpop.f32.mrb[22].mxu1 }
 0x25e   : > { %v1220_v39 = vpop.f32.mrb[23].mxu1 }
 0x25f   : > { %1082 = vmatmul.mubr.f32.gmra.mrb[34].mxu0 %v1704_v28  ;;  %1350 = vmatmul.mubr.f32.gmra.mrb[28].mxu1 %v1210_v33 }
 0x260   : > { %1355 = vmatprep.mubr.f32.mxu1 %v2148_v9 }
 0x263   : > { %1356 = vmatmul.mubr.f32.gmra.mrb[30].mxu1 %v1722_v32 }
 0x264   : > { %1361 = vmatprep.mubr.f32.mxu1 %v2148_v9 }
 0x267   : > { %1362 = vmatmul.mubr.f32.gmra.mrb[32].mxu1 %v1220_v39 }
 0x268   : > { %1367 = vmatprep.mubr.f32.mxu1 %v2148_v9  ;;  %v791_v9 = vpop.f32.mrb[20].mxu0 }
 0x269   : > { %v792_v18 = vadd.f32 %v791_v9, %v2580_v59  ;;  %v793_v23 = vpop.f32.mrb[21].mxu0 }
 0x26a   : > { %v794_v25 = vadd.f32 %v793_v23, %v2584_v60  ;;  %v797_v35 = vpop.f32.mrb[22].mxu0 }
 0x26b   : > { %1368 = vmatmul.mubr.f32.gmra.mrb[34].mxu1 %v1725_v38  ;;  %1534 = vst [vmem:[%s2570_s9 + $0xa0] sm:$0xff] %v792_v18  ;;  %v798_v37 = vadd.f32 %v797_v35, %v2580_v59  ;;  %v799_v45 = vpop.f32.mrb[23].mxu0 }
 0x26c   : > { %1535 = vst [vmem:[%s2570_s9 + $0xa8] sm:$0xff] %v794_v25  ;;  %v800_v46 = vadd.f32 %v799_v45, %v2584_v60 }
 0x26d   : > { %1536 = vst [vmem:[%s2570_s9 + $0xb0] sm:$0xff] %v798_v37 }
 0x26e   : > { %1537 = vst [vmem:[%s2570_s9 + $0xb8] sm:$0xff] %v800_v46 }
 0x31e   : > { %v1053_v50 = vpop.f32.mrb[24].mxu0 }
 0x31f   : > { %v1054_v51 = vadd.f32 %v1053_v50, %v980_v48  ;;  %v1055_v52 = vpop.f32.mrb[25].mxu0 }
 0x320   : > { %v1056_v53 = vadd.f32 %v1055_v52, %v984_v49 }
 0x321   : > { %1550 = vst [vmem:[%s2570_s9 + $0xc0] sm:$0xff] %v1054_v51 }
 0x322   : > { %1551 = vst [vmem:[%s2570_s9 + $0xc8] sm:$0xff] %v1056_v53  ;;  %v1059_v54 = vpop.f32.mrb[26].mxu0 }
 0x323   : > { %v1060_v55 = vadd.f32 %v1059_v54, %v980_v48  ;;  %v1061_v56 = vpop.f32.mrb[27].mxu0 }
 0x324   : > { %v1062_v57 = vadd.f32 %v1061_v56, %v984_v49 }
 0x325   : > { %1552 = vst [vmem:[%s2570_s9 + $0xd0] sm:$0xff] %v1060_v55 }
 0x326   : > { %1553 = vst [vmem:[%s2570_s9 + $0xd8] sm:$0xff] %v1062_v57  ;;  %v1065_v59 = vpop.f32.mrb[28].mxu0 }
 0x327   : > { %v1066_v60 = vadd.f32 %v1065_v59, %v980_v48  ;;  %v1067_v61 = vpop.f32.mrb[29].mxu0 }
 0x328   : > { %v1068_v63 = vadd.f32 %v1067_v61, %v984_v49 }
 0x329   : > { %1554 = vst [vmem:[%s2570_s9 + $0xe0] sm:$0xff] %v1066_v60 }
 0x32a   : > { %1555 = vst [vmem:[%s2570_s9 + $0xe8] sm:$0xff] %v1068_v63  ;;  %v1071_v1 = vpop.f32.mrb[30].mxu0  ;;  %v1339_v2 = vpop.f32.mrb[24].mxu1 }
 0x32b   : > { %v1072_v3 = vadd.f32 %v1071_v1, %v980_v48  ;;  %v1340_v4 = vadd.f32 %v1339_v2, %v1266_v62  ;;  %v1073_v5 = vpop.f32.mrb[31].mxu0  ;;  %v1341_v6 = vpop.f32.mrb[25].mxu1 }
 0x32c   : > { %v1074_v7 = vadd.f32 %v1073_v5, %v984_v49  ;;  %v1342_v10 = vadd.f32 %v1341_v6, %v1270_v0 }
 0x32d   : > { %1556 = vst [vmem:[%s2570_s9 + $0xf0] sm:$0xff] %v1072_v3  ;;  %1574 = vst [vmem:[%s2570_s9 + $0x120] sm:$0xff] %v1340_v4 }
 0x32e   : > { %1557 = vst [vmem:[%s2570_s9 + $0xf8] sm:$0xff] %v1074_v7  ;;  %1575 = vst [vmem:[%s2570_s9 + $0x128] sm:$0xff] %v1342_v10  ;;  %v1077_v34 = vpop.f32.mrb[32].mxu0  ;;  %v1345_v36 = vpop.f32.mrb[26].mxu1 }
 0x32f   : > { %v1078_v11 = vadd.f32 %v1077_v34, %v980_v48  ;;  %v1346_v12 = vadd.f32 %v1345_v36, %v1266_v62  ;;  %v1079_v14 = vpop.f32.mrb[33].mxu0  ;;  %v1347_v15 = vpop.f32.mrb[27].mxu1 }
 0x330   : > { %v1080_v16 = vadd.f32 %v1079_v14, %v984_v49  ;;  %v1348_v19 = vadd.f32 %v1347_v15, %v1270_v0 }
 0x331   : > { %1558 = vst [vmem:[%s2570_s9 + $0x100] sm:$0xff] %v1078_v11  ;;  %1576 = vst [vmem:[%s2570_s9 + $0x130] sm:$0xff] %v1346_v12 }
 0x332   : > { %1559 = vst [vmem:[%s2570_s9 + $0x108] sm:$0xff] %v1080_v16  ;;  %1577 = vst [vmem:[%s2570_s9 + $0x138] sm:$0xff] %v1348_v19  ;;  %v1083_v20 = vpop.f32.mrb[34].mxu0  ;;  %v1351_v21 = vpop.f32.mrb[28].mxu1 }
 0x333   : > { %v1084_v22 = vadd.f32 %v1083_v20, %v980_v48  ;;  %v1352_v24 = vadd.f32 %v1351_v21, %v1266_v62  ;;  %v1085_v26 = vpop.f32.mrb[35].mxu0  ;;  %v1353_v27 = vpop.f32.mrb[29].mxu1 }
 0x334   : > { %v1086_v28 = vadd.f32 %v1085_v26, %v984_v49  ;;  %v1354_v29 = vadd.f32 %v1353_v27, %v1270_v0 }
 0x335   : > { %1560 = vst [vmem:[%s2570_s9 + $0x110] sm:$0xff] %v1084_v22  ;;  %1578 = vst [vmem:[%s2570_s9 + $0x140] sm:$0xff] %v1352_v24 }
 0x336   : > { %1561 = vst [vmem:[%s2570_s9 + $0x118] sm:$0xff] %v1086_v28  ;;  %1579 = vst [vmem:[%s2570_s9 + $0x148] sm:$0xff] %v1354_v29  ;;  %v1357_v30 = vpop.f32.mrb[30].mxu1 }
 0x337   : > { %v1358_v31 = vadd.f32 %v1357_v30, %v1266_v62  ;;  %v1359_v32 = vpop.f32.mrb[31].mxu1 }
 0x338   : > { %v1360_v33 = vadd.f32 %v1359_v32, %v1270_v0 }
 0x339   : > { %1580 = vst [vmem:[%s2570_s9 + $0x150] sm:$0xff] %v1358_v31 }
 0x33a   : > { %1581 = vst [vmem:[%s2570_s9 + $0x158] sm:$0xff] %v1360_v33  ;;  %v1363_v38 = vpop.f32.mrb[32].mxu1 }
 0x33b   : > { %v1364_v39 = vadd.f32 %v1363_v38, %v1266_v62  ;;  %v1365_v40 = vpop.f32.mrb[33].mxu1 }
 0x33c   : > { %v1366_v41 = vadd.f32 %v1365_v40, %v1270_v0 }
 0x33d   : > { %1582 = vst [vmem:[%s2570_s9 + $0x160] sm:$0xff] %v1364_v39 }
 0x33e   : > { %1583 = vst [vmem:[%s2570_s9 + $0x168] sm:$0xff] %v1366_v41  ;;  %v1369_v42 = vpop.f32.mrb[34].mxu1 }
 0x33f   : > { %v1370_v43 = vadd.f32 %v1369_v42, %v1266_v62  ;;  %v1371_v44 = vpop.f32.mrb[35].mxu1 }
 0x340   : > { %v1372_v8 = vadd.f32 %v1371_v44, %v1270_v0 }
 0x341   : > { %1584 = vst [vmem:[%s2570_s9 + $0x170] sm:$0xff] %v1370_v43 }
 0x342   : > { %1585 = vst [vmem:[%s2570_s9 + $0x178] sm:$0xff] %v1372_v8 }
 0x343   : > { %2078 = shalt.err (!%p2075_p12)
}
 0x344   : > { %s2079_s7 = scalar_lea.hbm %s2664_s29, 6144  ;;  %s2083_s12 = scalar_lea.hbm %s2716_s4, 12288 }
 0x345   : > { %p2080_p3 = scmp.ne.s32.totalorder %s2664_s29, %s2079_s7  ;;  %p2084_p7 = scmp.lt.u32.totalorder %s2664_s29, %s2716_s4 }
 0x346   : > { %p2085_p9 = scmp.lt.u32.totalorder %s2083_s12, %s2079_s7  ;;  %p2087_p10 = scmp.lt.u32.totalorder %s2079_s7, %s2664_s29 }
 0x347   : > { %p2081_p6 = pnand %p2080_p3, %p2744_p1 }
 0x348   : > { %p2086_p8 = por %p2085_p9, %p2084_p7 }
 0x349   : > { %p2082_p13 = pneg %p2081_p6 }
 0x34a   : > { %p2088_p4 = por %p2087_p10, %p2086_p8 }
 0x34c   : > { %p2089_p0 = pnand %p2088_p4, %p2082_p13 }
 0x34e   : > { %2092 = shalt.err (!%p2089_p0)
}
 0x34f   : > { %s2150_s13 = smov 256   ;;  %s2151_s20 = smov 16  }
 0x350   : > { %1915 = dma.vmem_to_hbm [thread:$0]  (%p2744_p1), %s2666_s25, 6144, %s2664_s29, %s1390_s19, %s2150_s13, %s2150_s13, %s2151_s20  }
 0x351 PF: > { %s1419_s5 = sand.u32 1, %s2127_s15   ;;  %p2745_p2 = scmp.ne.s32.totalorder %s2728_s28, 0 }
 0x352   : > { %p2746_p5 = scmp.ge.s32.totalorder %s2139_s18, 2  ;;  %s1420_s22 = scalar_lea.sflag [#allocation4], %s1419_s5 }
 0x354   : > { %p1929_p11 = pnand %p2746_p5, %p2745_p2 }
 0x356   : > { %2122 = dma.done.wait (!%p1929_p11), %s1420_s22, 6144  }
 0x357   : > { %2124 = vsyncadd (!%p1929_p11), %s1420_s22, 4294961152  ;;  %p16_p12 = scmp.ge.s32.totalorder %s2202_s21, 4   ;;  %s2747_s15 = smov %s2131_s16 }
 0x358   : > { %s2748_s16 = smov %s2135_s17  ;;  %s2749_s17 = smov %s2214_s24 }
 0x359   : > { %s2750_s18 = smov %s2202_s21  ;;  %18 = sbr.rel (!%p16_p12) target bundleno = 7 (0x7), region = 95 }
 0x360   :  { %1425 = vsyncpa [#allocation3], 1 }
 0x361   :  { %1427 = vsyncpa [#allocation3 + $0x1], 1 }
 0x362   :  { %1428 = vsyncpa [#allocation6], 1 }
 0x363   :  { %1429 = vsyncpa [#allocation4], 1 }
 0x364   :  { %1431 = vsyncpa [#allocation4 + $0x1], 1 }

</bundles_post_ra>
